<compile_context>
chip_gen: v7x
topology: tpu7x:2x2x1
jax: 0.10.0
libtpu: 0.0.40
codegen_flags: <defaults>
</compile_context>

<pallas_src>
import jax
import jax.numpy as jnp
from jax.experimental import pallas as pl
from jax.experimental.pallas import tpu as pltpu


def mlp_kernel(x_ref, w1_ref, b1_ref, w2_ref, b2_ref, o_ref):
    # fc1 on the MXU with bf16 inputs, f32 accumulation.
    x = x_ref[...].astype(w1_ref.dtype)
    h = jnp.dot(x, w1_ref[...], preferred_element_type=jnp.float32)
    # Bias + ReLU on the f32 accumulator (no bf16 elementwise — v5e-friendly).
    h = jnp.maximum(h + b1_ref[...], 0.0)
    # fc2: downcast the activation only for the MXU input; accumulate in f32.
    out = jnp.dot(h.astype(w2_ref.dtype), w2_ref[...],
                  preferred_element_type=jnp.float32)
    o_ref[...] = (out + b2_ref[...]).astype(o_ref.dtype)


def _round_up(n, m):
    return ((n + m - 1) // m) * m


def prepare_mlp_params(w1, b1, w2, b2, *, param_dtype=jnp.bfloat16):
    """One-time parameter prep (do NOT call per forward pass).

    PyTorch layout in:  w1 (H, D), b1 (H,), w2 (C, H), b2 (C,).
    Returns MXU-ready operands:
      w1t (D, H_p) param_dtype, b1 (1, H_p) f32,
      w2t (H_p, C_p) param_dtype, b2 (1, C_p) f32.
    Zero-padding H/C to multiples of 128 is mathematically a no-op
    (zero W1^T cols -> zero h cols -> zero W2^T rows; zero bias pads).
    """
    H, D = w1.shape
    C = w2.shape[0]
    H_p = _round_up(H, 128)
    C_p = _round_up(C, 128)
    w1t = jnp.pad(jnp.transpose(w1), ((0, 0), (0, H_p - H))).astype(param_dtype)
    b1_p = jnp.pad(b1, (0, H_p - H)).reshape(1, H_p).astype(jnp.float32)
    w2t = jnp.pad(jnp.transpose(w2), ((0, H_p - H), (0, C_p - C))).astype(param_dtype)
    b2_p = jnp.pad(b2, (0, C_p - C)).reshape(1, C_p).astype(jnp.float32)
    return w1t, b1_p, w2t, b2_p, C


def mlp_forward(x, w1t, b1_p, w2t, b2_p, num_classes, *, batch_tile=128):
    """x: (B, D). Params from prepare_mlp_params. Returns (B, num_classes) f32.

    batch_tile: 128 keeps >=2 parallel grid steps at B>=256 (v7x megacore);
    on single-TC v5e/v6e, larger tiles (256-512) amortize per-step overhead.
    """
    B, D = x.shape
    assert w1t.shape[0] == D, "x feature dim must match prepared W1^T K extent"
    H_p = w1t.shape[1]
    C_p = w2t.shape[1]

    batch_tile = max(8, min(batch_tile, _round_up(B, 8)))
    grid = (pl.cdiv(B, batch_tile),)

    # VMEM: resident weights + double-buffered x/out tiles are well under the
    # 32 MiB scoped default (and v7x's 64 MiB physical limit) at these sizes.
    out_p = pl.pallas_call(
        mlp_kernel,
        out_shape=jax.ShapeDtypeStruct((B, C_p), jnp.float32),
        grid_spec=pltpu.PrefetchScalarGridSpec(
            num_scalar_prefetch=0,
            grid=grid,
            in_specs=[
                # x tile: last dim = full D (no padding copy); last block may be
                # a partial batch block — only valid output rows are written.
                pl.BlockSpec((batch_tile, D), lambda i: (i, 0)),
                pl.BlockSpec((D, H_p), lambda i: (0, 0)),    # W1^T (VMEM-resident)
                pl.BlockSpec((1, H_p), lambda i: (0, 0)),    # b1
                pl.BlockSpec((H_p, C_p), lambda i: (0, 0)),  # W2^T (VMEM-resident)
                pl.BlockSpec((1, C_p), lambda i: (0, 0)),    # b2
            ],
            out_specs=pl.BlockSpec((batch_tile, C_p), lambda i: (i, 0)),
        ),
        compiler_params=pltpu.CompilerParams(
            dimension_semantics=("parallel",),
        ),
    )(x, w1t, b1_p, w2t, b2_p)

    # Only the lane-padded class columns are sliced off; no batch-row slice.
    return out_p[:, :num_classes]


if __name__ == "__main__":
    # Small, module-consistent sizes (MLP takes input_size/hidden_size/num_classes
    # as constructor args): input_size = 8*8*3 = 192, hidden_size = 500 (padded
    # to 512 lanes once), num_classes = 30 (padded to 128 lanes once).
    # batch = 256 so the parallel batch grid has 2 steps at tile = 128.
    batch = 256
    input_size = 8 * 8 * 3   # 192
    hidden_size = 500
    num_classes = 30

    key = jax.random.PRNGKey(0)
    kx, kw1, kb1, kw2, kb2 = jax.random.split(key, 5)

    x = jax.random.normal(kx, (batch, input_size), dtype=jnp.float32)

    # Deterministic PyTorch-style init: U(-1/sqrt(fan_in), 1/sqrt(fan_in)).
    bound1 = 1.0 / (input_size ** 0.5)
    w1 = jax.random.uniform(kw1, (hidden_size, input_size), jnp.float32,
                            minval=-bound1, maxval=bound1)
    b1 = jax.random.uniform(kb1, (hidden_size,), jnp.float32,
                            minval=-bound1, maxval=bound1)
    bound2 = 1.0 / (hidden_size ** 0.5)
    w2 = jax.random.uniform(kw2, (num_classes, hidden_size), jnp.float32,
                            minval=-bound2, maxval=bound2)
    b2 = jax.random.uniform(kb2, (num_classes,), jnp.float32,
                            minval=-bound2, maxval=bound2)

    # One-time parameter prep (transpose + pad + bf16 cast), then the call.
    w1t, b1_p, w2t, b2_p, C = prepare_mlp_params(w1, b1, w2, b2)
    out = mlp_forward(x, w1t, b1_p, w2t, b2_p, C)
    out = jax.block_until_ready(out)

    # Reference emulating the kernel's numerics: bf16 MXU inputs, f32 accumulate,
    # f32 bias/ReLU epilogues.
    h_ref = jnp.dot(x.astype(jnp.bfloat16), jnp.transpose(w1).astype(jnp.bfloat16),
                    preferred_element_type=jnp.float32)
    h_ref = jnp.maximum(h_ref + b1, 0.0)
    ref = jnp.dot(h_ref.astype(jnp.bfloat16), jnp.transpose(w2).astype(jnp.bfloat16),
                  preferred_element_type=jnp.float32) + b2

    assert out.shape == (batch, num_classes)
    assert jnp.allclose(out, ref, atol=5e-3, rtol=5e-3), "mismatch vs reference"

    print("KERNEL_OK")
</pallas_src>

<mosaic_0001>
module attributes {stable_mosaic.version = 11 : i64} {
  func.func @mlp_kernel(%arg0: i32, %arg1: memref<128x192xf32, #tpu.memory_space<vmem>>, %arg2: memref<192x512xbf16, #tpu.memory_space<vmem>>, %arg3: memref<1x512xf32, #tpu.memory_space<vmem>>, %arg4: memref<512x128xbf16, #tpu.memory_space<vmem>>, %arg5: memref<1x128xf32, #tpu.memory_space<vmem>>, %arg6: memref<128x128xf32, #tpu.memory_space<vmem>>) attributes {dimension_semantics = [#tpu.dimension_semantics<parallel>], iteration_bounds = array<i64: 2>, scalar_prefetch = 0 : i64, scratch_operands = 0 : i64, tpu.core_type = #tpu.core_type<tc>, window_params = [{transform_indices = @transform_0, window_bounds = array<i64: 128, 192>}, {pipeline_mode = #tpu.pipeline_mode<synchronous>, transform_indices = @transform_1, window_bounds = array<i64: 192, 512>}, {pipeline_mode = #tpu.pipeline_mode<synchronous>, transform_indices = @transform_2, window_bounds = array<i64: 1, 512>}, {pipeline_mode = #tpu.pipeline_mode<synchronous>, transform_indices = @transform_3, window_bounds = array<i64: 512, 128>}, {pipeline_mode = #tpu.pipeline_mode<synchronous>, transform_indices = @transform_4, window_bounds = array<i64: 1, 128>}, {transform_indices = @transform_5, window_bounds = array<i64: 128, 128>}]} {
    %c0 = arith.constant 0 : index
    %c0_0 = arith.constant 0 : index
    %0 = vector.load %arg1[%c0, %c0_0] : memref<128x192xf32, #tpu.memory_space<vmem>>, vector<128x192xf32>
    %1 = arith.truncf %0 : vector<128x192xf32> to vector<128x192xbf16>
    %c0_1 = arith.constant 0 : index
    %c0_2 = arith.constant 0 : index
    %2 = vector.load %arg2[%c0_1, %c0_2] : memref<192x512xbf16, #tpu.memory_space<vmem>>, vector<192x512xbf16>
    %cst = arith.constant dense<0.000000e+00> : vector<128x512xf32>
    %3 = tpu.matmul %1, %2, %cst {dimension_numbers = #tpu.dot_dimension_numbers<[1], [0], [0], [1], [0, 0, 1, 1], [], []>} : vector<128x192xbf16>, vector<192x512xbf16>, vector<128x512xf32> -> vector<128x512xf32>
    %c0_3 = arith.constant 0 : index
    %c0_4 = arith.constant 0 : index
    %4 = vector.load %arg3[%c0_3, %c0_4] : memref<1x512xf32, #tpu.memory_space<vmem>>, vector<1x512xf32>
    %5 = vector.broadcast %4 : vector<1x512xf32> to vector<128x512xf32>
    %6 = arith.addf %3, %5 : vector<128x512xf32>
    %cst_5 = arith.constant 0.000000e+00 : f32
    %7 = vector.broadcast %cst_5 : f32 to vector<128x512xf32>
    %8 = arith.maximumf %6, %7 : vector<128x512xf32>
    %9 = arith.truncf %8 : vector<128x512xf32> to vector<128x512xbf16>
    %c0_6 = arith.constant 0 : index
    %c0_7 = arith.constant 0 : index
    %10 = vector.load %arg4[%c0_6, %c0_7] : memref<512x128xbf16, #tpu.memory_space<vmem>>, vector<512x128xbf16>
    %cst_8 = arith.constant dense<0.000000e+00> : vector<128x128xf32>
    %11 = tpu.matmul %9, %10, %cst_8 {dimension_numbers = #tpu.dot_dimension_numbers<[1], [0], [0], [1], [0, 0, 1, 1], [], []>} : vector<128x512xbf16>, vector<512x128xbf16>, vector<128x128xf32> -> vector<128x128xf32>
    %c0_9 = arith.constant 0 : index
    %c0_10 = arith.constant 0 : index
    %12 = vector.load %arg5[%c0_9, %c0_10] : memref<1x128xf32, #tpu.memory_space<vmem>>, vector<1x128xf32>
    %13 = vector.broadcast %12 : vector<1x128xf32> to vector<128x128xf32>
    %14 = arith.addf %11, %13 : vector<128x128xf32>
    %c0_11 = arith.constant 0 : index
    %c0_12 = arith.constant 0 : index
    %15 = vector.load %arg6[%c0_11, %c0_12] : memref<128x128xf32, #tpu.memory_space<vmem>>, vector<128x128xf32>
    tpu.vector_store %arg6[%c0_11, %c0_12], %14 {strides = array<i32>} : memref<128x128xf32, #tpu.memory_space<vmem>>, vector<128x128xf32>,
    return
  }
  func.func @transform_0(%arg0: i32) -> (i32, i32) {
    %c0_i32 = arith.constant 0 : i32
    %c0_i32_0 = arith.constant 0 : i32
    return %arg0, %c0_i32 : i32, i32
  }
  func.func @transform_1(%arg0: i32) -> (i32, i32) {
    %c0_i32 = arith.constant 0 : i32
    %c0_i32_0 = arith.constant 0 : i32
    %c0_i32_1 = arith.constant 0 : i32
    return %c0_i32, %c0_i32_0 : i32, i32
  }
  func.func @transform_2(%arg0: i32) -> (i32, i32) {
    %c0_i32 = arith.constant 0 : i32
    %c0_i32_0 = arith.constant 0 : i32
    %c0_i32_1 = arith.constant 0 : i32
    return %c0_i32, %c0_i32_0 : i32, i32
  }
  func.func @transform_3(%arg0: i32) -> (i32, i32) {
    %c0_i32 = arith.constant 0 : i32
    %c0_i32_0 = arith.constant 0 : i32
    %c0_i32_1 = arith.constant 0 : i32
    return %c0_i32, %c0_i32_0 : i32, i32
  }
  func.func @transform_4(%arg0: i32) -> (i32, i32) {
    %c0_i32 = arith.constant 0 : i32
    %c0_i32_0 = arith.constant 0 : i32
    %c0_i32_1 = arith.constant 0 : i32
    return %c0_i32, %c0_i32_0 : i32, i32
  }
  func.func @transform_5(%arg0: i32) -> (i32, i32) {
    %c0_i32 = arith.constant 0 : i32
    %c0_i32_0 = arith.constant 0 : i32
    return %arg0, %c0_i32 : i32, i32
  }
}

</mosaic_0001>

<bundles_post_ra>
// kernel: tpu_custom_call.1
= control target key start
LH: loop header
LB: loop body
LE: loop exit
PB: predicated region body
PF: predicated region fallthrough
CT: control target
= control target key end

     0   :  { %10 = vsyncpa [#allocation3], 0  ;;  %s2477_s0 = inlined_call_operand.vmem [shape: f32[256,192], index: 0, kind: input, shape index: {}]   ;;  %s2478_s1 = inlined_call_operand.vmem [shape: bf16[192,512], index: 1, kind: input, shape index: {}]   ;;  %s2479_s2 = inlined_call_operand.vmem [shape: f32[1,512], index: 2, kind: input, shape index: {}]   ;;  %s2480_s3 = inlined_call_operand.vmem [shape: bf16[512,128], index: 3, kind: input, shape index: {}]   ;;  %s2481_s4 = inlined_call_operand.vmem [shape: f32[1,128], index: 4, kind: input, shape index: {}]   ;;  %s2482_s5 = inlined_call_operand.hbm [shape: f32[256,128], index: 5, kind: output, shape index: {}]  }
   0x1   :  { %12 = vsyncpa [#allocation3 + $0x1], 0  ;;  %s1966_s18 = smov 0   ;;  %s1968_s19 = smov 0  }
   0x2   :  { %s1970_s20 = smov 0   ;;  %s1972_s21 = smov 0  }
   0x3 LB: > { %s1987_s22 = sadd.s32 4294967295, %s1931_s21   ;;  %s1484_s23 = sadd.s32 4294967294, %s1931_s21   ;;  %s1931_s21 = sphi %s1972_s21, %s2488_s21   ;;  %s1927_s20 = sphi %s1970_s20, %s2487_s20   ;;  %s1923_s19 = sphi %s1968_s19, %s2486_s19   ;;  %s1919_s18 = sphi %s1966_s18, %s2485_s18  }
   0x4   : > { %s1991_s24 = sadd.s32 1, %s1931_s21   ;;  %s135_s25 = sadd.s32 1, %s1927_s20 }
   0x5   : > { %s132_s26 = ssub.s32 %s1931_s21, %s1991_s24  ;;  %p145_p0 = scmp.ne.s32.totalorder %s1927_s20, %s1923_s19 }
   0x6   : > { %p133_p1 = scmp.eq.s32.totalorder %s132_s26, 0  ;;  %p146_p2 = scmp.eq.s32.totalorder %s1987_s22, 1 }
   0x7   : > { %p151_p3 = scmp.ne.s32.totalorder %s1923_s19, %s1919_s18  ;;  %p152_p4 = scmp.eq.s32.totalorder %s1484_s23, 1 }
   0x8   : > { %s2002_s27 = scalar_select %p133_p1, %s1927_s20, %s135_s25  }
   0x9   : > { %p2004_p5 = por %p146_p2, %p145_p0  ;;  %p2008_p6 = por %p152_p4, %p151_p3 }
   0xa   : > { %p1487_p7 = scmp.ge.s32.totalorder %s1931_s21, 1  ;;  %p192_p8 = scmp.lt.s32.totalorder %s1931_s21, 3 }
   0xc   : > { %p193_p9 = pnand %p1487_p7, %p192_p8 }
   0xd   : > { %v1765_v0 = vld [vmem:[%s2478_s1 + $0x4] ss:$16 sps:$4 sm:$0xff] (!%p193_p9)   ;;  %v1767_v1 = vld [vmem:[%s2478_s1 + $0xc] ss:$16 sps:$4 sm:$0xff] (!%p193_p9)   ;;  %v1769_v2 = vld [vmem:[%s2478_s1] ss:$16 sps:$4 sm:$0xff] (!%p193_p9)  }
   0xe   : > { %196 = sbr.rel (%p193_p9) target bundleno = 576 (0x240), region = 40  ;;  %613 = vmatprep.subr.bf16.mxu0 (!%p193_p9), %v1765_v0  ;;  %v1770_v3 = vld [vmem:[%s2478_s1 + $0x8] ss:$16 sps:$4 sm:$0xff] (!%p193_p9)   ;;  %726 = vmatprep.subr.bf16.mxu1 (!%p193_p9), %v1767_v1  ;;  %v1771_v4 = vld [vmem:[%s2478_s1 + $0x24] ss:$16 sps:$4 sm:$0xff] (!%p193_p9)   ;;  %s1489_s13 = sshll.u32 (!%p193_p9), %s1987_s22, 4 }
   0xf   : > { %614 = vmatpush1.bf16.msra.mxu0 (!%p193_p9), %v1769_v2  ;;  %727 = vmatpush1.bf16.msra.mxu1 (!%p193_p9), %v1770_v3  ;;  %v1773_v5 = vld [vmem:[%s2478_s1 + $0x2c] ss:$16 sps:$4 sm:$0xff] (!%p193_p9)   ;;  %v1775_v6 = vld [vmem:[%s2478_s1 + $0x20] ss:$16 sps:$4 sm:$0xff] (!%p193_p9)   ;;  %v1776_v7 = vld [vmem:[%s2478_s1 + $0x28] ss:$16 sps:$4 sm:$0xff] (!%p193_p9)  }
  0x10   : > { %615 = vmatprep.subr.bf16.mxu0 (!%p193_p9), %v1771_v4  ;;  %728 = vmatprep.subr.bf16.mxu1 (!%p193_p9), %v1773_v5  ;;  %v1777_v8 = vld [vmem:[%s2478_s1 + $0x44] ss:$16 sps:$4 sm:$0xff] (!%p193_p9)   ;;  %v1779_v9 = vld [vmem:[%s2478_s1 + $0x4c] ss:$16 sps:$4 sm:$0xff] (!%p193_p9)   ;;  %v1781_v10 = vld [vmem:[%s2478_s1 + $0x40] ss:$16 sps:$4 sm:$0xff] (!%p193_p9)  }
  0x11   : > { %v1782_v11 = vld [vmem:[%s2478_s1 + $0x48] ss:$16 sps:$4 sm:$0xff] (!%p193_p9)   ;;  %v1783_v12 = vld [vmem:[%s2478_s1 + $0x64] ss:$16 sps:$4 sm:$0xff] (!%p193_p9)   ;;  %v1785_v13 = vld [vmem:[%s2478_s1 + $0x6c] ss:$16 sps:$4 sm:$0xff] (!%p193_p9)  }
  0x12   : > { %v1787_v14 = vld [vmem:[%s2478_s1 + $0x60] ss:$16 sps:$4 sm:$0xff] (!%p193_p9)   ;;  %v1788_v15 = vld [vmem:[%s2478_s1 + $0x68] ss:$16 sps:$4 sm:$0xff] (!%p193_p9)   ;;  %v1789_v16 = vld [vmem:[%s2478_s1 + $0x84] ss:$16 sps:$4 sm:$0xff] (!%p193_p9)  }
  0x13   : > { %616 = vmatpush1.bf16.msra.mxu0 (!%p193_p9), %v1775_v6  ;;  %729 = vmatpush1.bf16.msra.mxu1 (!%p193_p9), %v1776_v7  ;;  %v1791_v17 = vld [vmem:[%s2478_s1 + $0x8c] ss:$16 sps:$4 sm:$0xff] (!%p193_p9)   ;;  %v1793_v18 = vld [vmem:[%s2478_s1 + $0x80] ss:$16 sps:$4 sm:$0xff] (!%p193_p9)   ;;  %v1794_v19 = vld [vmem:[%s2478_s1 + $0x88] ss:$16 sps:$4 sm:$0xff] (!%p193_p9)  }
  0x14   : > { %617 = vmatprep.subr.bf16.mxu0 (!%p193_p9), %v1777_v8  ;;  %730 = vmatprep.subr.bf16.mxu1 (!%p193_p9), %v1779_v9  ;;  %v1795_v20 = vld [vmem:[%s2478_s1 + $0xa4] ss:$16 sps:$4 sm:$0xff] (!%p193_p9)   ;;  %v1797_v21 = vld [vmem:[%s2478_s1 + $0xac] ss:$16 sps:$4 sm:$0xff] (!%p193_p9)   ;;  %p222_p10 = scmp.lt.s32.totalorder (!%p193_p9), %s1489_s13, 31  ;;  %vm588_vm0 = vcmask (!%p193_p9), 523264  }
  0x15   : > { %v1799_v22 = vld [vmem:[%s2478_s1 + $0xa0] ss:$16 sps:$4 sm:$0xff]   ;;  %v1800_v23 = vld [vmem:[%s2478_s1 + $0xa8] ss:$16 sps:$4 sm:$0xff]   ;;  %v1801_v24 = vld [vmem:[%s2478_s1 + $0xc4] ss:$16 sps:$4 sm:$0xff]  }
  0x16   : > { %v1803_v25 = vld [vmem:[%s2478_s1 + $0xcc] ss:$16 sps:$4 sm:$0xff]   ;;  %s2490_s13 = smov (!%p222_p10, %s1489_s13), 31  ;;  %v1805_v26 = vld [vmem:[%s2478_s1 + $0xc0] ss:$16 sps:$4 sm:$0xff]   ;;  %s218_s23 = sand.u32 1, %s1923_s19  }
  0x17   : > { %618 = vmatpush1.bf16.msra.mxu0 %v1781_v10  ;;  %731 = vmatpush1.bf16.msra.mxu1 %v1782_v11  ;;  %v1806_v27 = vld [vmem:[%s2478_s1 + $0xc8] ss:$16 sps:$4 sm:$0xff]   ;;  %v1807_v28 = vld [vmem:[%s2478_s1 + $0xe4] ss:$16 sps:$4 sm:$0xff]   ;;  %v1809_v29 = vld [vmem:[%s2478_s1 + $0xec] ss:$16 sps:$4 sm:$0xff]  }
  0x18   : > { %619 = vmatprep.subr.bf16.mxu0 %v1783_v12  ;;  %732 = vmatprep.subr.bf16.mxu1 %v1785_v13  ;;  %s1594_s25 = sshll.u32 %s2490_s13, 4  ;;  %v1811_v30 = vld [vmem:[%s2478_s1 + $0xe0] ss:$16 sps:$4 sm:$0xff]   ;;  %v1812_v31 = vld [vmem:[%s2478_s1 + $0xe8] ss:$16 sps:$4 sm:$0xff]   ;;  %s1488_s30 = sshll.u32 %s218_s23, 7 }
  0x19   : > { %v1813_v32 = vld [vmem:[%s2478_s1 + $0x104] ss:$16 sps:$4 sm:$0xff]   ;;  %v1815_v33 = vld [vmem:[%s2478_s1 + $0x10c] ss:$16 sps:$4 sm:$0xff]   ;;  %s2120_s14 = scalar_lea.vmem %s2477_s0, %s1594_s25  ;;  %v1817_v34 = vld [vmem:[%s2478_s1 + $0x100] ss:$16 sps:$4 sm:$0xff]  }
  0x1a   : > { %v1818_v35 = vld [vmem:[%s2478_s1 + $0x108] ss:$16 sps:$4 sm:$0xff]   ;;  %v1819_v38 = vld [vmem:[%s2478_s1 + $0x124] ss:$16 sps:$4 sm:$0xff]   ;;  %v1821_v39 = vld [vmem:[%s2478_s1 + $0x12c] ss:$16 sps:$4 sm:$0xff]  }
  0x1b   : > { %620 = vmatpush1.bf16.msra.mxu0 %v1787_v14  ;;  %733 = vmatpush1.bf16.msra.mxu1 %v1788_v15  ;;  %v231_v36 = vld [vmem:[%s2120_s14 + $0x8] sm:$0xff]  ;;  %v233_v37 = vld [vmem:[%s2120_s14 + $0x18] sm:$0xff]  ;;  %v1823_v41 = vld [vmem:[%s2478_s1 + $0x120] ss:$16 sps:$4 sm:$0xff]   ;;  %s2393_s6 = scalar_lea.vmem [#allocation2], %s1488_s30  ;;  %s1595_s7 = sshll.u32 %s1987_s22, 11 }
  0x1c   : > { %621 = vmatprep.subr.bf16.mxu0 %v1789_v16  ;;  %734 = vmatprep.subr.bf16.mxu1 %v1791_v17  ;;  %v263_v40 = vpack.c.bf16 %v233_v37, %v231_v36  ;;  %v1824_v42 = vld [vmem:[%s2478_s1 + $0x128] ss:$16 sps:$4 sm:$0xff]   ;;  %v1825_v43 = vld [vmem:[%s2478_s1 + $0x144] ss:$16 sps:$4 sm:$0xff]   ;;  %v1827_v44 = vld [vmem:[%s2478_s1 + $0x14c] ss:$16 sps:$4 sm:$0xff]   ;;  %s2428_s11 = scalar_lea.hbm %s2482_s5, %s1595_s7 }
  0x1d   : > { %v1829_v45 = vld [vmem:[%s2478_s1 + $0x140] ss:$16 sps:$4 sm:$0xff]   ;;  %v1830_v46 = vld [vmem:[%s2478_s1 + $0x148] ss:$16 sps:$4 sm:$0xff]   ;;  %v1831_v47 = vld [vmem:[%s2478_s1 + $0x164] ss:$16 sps:$4 sm:$0xff]  }
  0x1e   : > { %1540 = vmatprep.mubr.msk.bf16.mxu0 %vm588_vm0, %v263_v40  ;;  %1548 = vmatprep.mubr.msk.bf16.mxu1 %vm588_vm0, %v263_v40  ;;  %v1833_v48 = vld [vmem:[%s2478_s1 + $0x16c] ss:$16 sps:$4 sm:$0xff]   ;;  %v1835_v49 = vld [vmem:[%s2478_s1 + $0x160] ss:$16 sps:$4 sm:$0xff]   ;;  %v1836_v50 = vld [vmem:[%s2478_s1 + $0x168] ss:$16 sps:$4 sm:$0xff]  }
  0x1f   : > { %622 = vmatpush1.bf16.msra.mxu0 %v1793_v18  ;;  %735 = vmatpush1.bf16.msra.mxu1 %v1794_v19  ;;  %v230_v51 = vld [vmem:[%s2120_s14] sm:$0xff]  ;;  %v232_v52 = vld [vmem:[%s2120_s14 + $0x10] sm:$0xff]  ;;  %v235_v53 = vld [vmem:[%s2120_s14 + $0x28] sm:$0xff]  ;;  %s1422_s8 = sshll.u32 %s2393_s6, 4  ;;  %s2436_s13 = scalar_lea.sflag [#allocation3], %s218_s23  ;;  %s2430_s8 = int_to_ptr.vmem [resolvable:$true] %s1422_s8 }
  0x20   : > { %623 = vmatprep.subr.bf16.mxu0 %v1795_v20  ;;  %736 = vmatprep.subr.bf16.mxu1 %v1797_v21  ;;  %v237_v54 = vld [vmem:[%s2120_s14 + $0x38] sm:$0xff]  ;;  %v1837_v55 = vld [vmem:[%s2480_s3 + $0x40] sm:$0xff]   ;;  %v262_v57 = vpack.c.bf16 %v232_v52, %v230_v51  ;;  %v1841_v61 = vld [vmem:[%s2480_s3 + $0x48] sm:$0xff]   ;;  %s1869_s22 = scalar_lea.vmem %s2430_s8, 2048  ;;  %s1933_s12 = smov [#allocation2]  }
  0x21   : > { %v1839_v56 = vld [vmem:[%s2480_s3 + $0xc0] sm:$0xff]   ;;  %v265_v59 = vpack.c.bf16 %v237_v54, %v235_v53  ;;  %v236_v63 = vld [vmem:[%s2120_s14 + $0x30] sm:$0xff]  ;;  %v1843_v0 = vld [vmem:[%s2480_s3 + $0xc8] sm:$0xff]   ;;  %p1870_p11 = scmp.ne.s32.totalorder %s2430_s8, %s1869_s22  ;;  %s1873_s15 = sshll.u32 %s1933_s12, 4  ;;  %s1874_s15 = int_to_ptr.vmem [resolvable:$false] %s1873_s15 }
  0x22   : > { %v1838_v58 = vld [vmem:[%s2480_s3] sm:$0xff]   ;;  %v239_v1 = vld [vmem:[%s2120_s14 + $0x48] sm:$0xff]  ;;  %v241_v2 = vld [vmem:[%s2120_s14 + $0x58] sm:$0xff]  ;;  %s1875_s16 = scalar_lea.vmem %s1874_s15, 4096  ;;  %p1876_p0 = scmp.lt.s32.totalorder %s2430_s8, %s1874_s15 }
  0x23   : > { %624 = vmatpush1.bf16.msra.mxu0 %v1799_v22  ;;  %737 = vmatpush1.bf16.msra.mxu1 %v1800_v23  ;;  %v1840_v60 = vld [vmem:[%s2480_s3 + $0x80] sm:$0xff]   ;;  %v1842_v3 = vld [vmem:[%s2480_s3 + $0x8] sm:$0xff]   ;;  %v1845_v5 = vld [vmem:[%s2480_s3 + $0x50] sm:$0xff]   ;;  %v267_v9 = vpack.c.bf16 %v241_v2, %v239_v1  ;;  %p1871_p12 = pnand %p1870_p11, %p2004_p5  ;;  %p1877_p1 = scmp.lt.s32.totalorder %s1875_s16, %s1869_s22 }
  0x24   : > { %625 = vmatprep.subr.bf16.mxu0 %v1801_v24  ;;  %738 = vmatprep.subr.bf16.mxu1 %v1803_v25  ;;  %v234_v62 = vld [vmem:[%s2120_s14 + $0x20] sm:$0xff]  ;;  %v1844_v4 = vld [vmem:[%s2480_s3 + $0x88] sm:$0xff]   ;;  %v1847_v6 = vld [vmem:[%s2480_s3 + $0xd0] sm:$0xff]  }
  0x25   : > { %v264_v7 = vpack.c.bf16 %v236_v63, %v234_v62  ;;  %v1846_v8 = vld [vmem:[%s2480_s3 + $0x10] sm:$0xff]   ;;  %v1849_v11 = vld [vmem:[%s2480_s3 + $0x58] sm:$0xff]   ;;  %v238_v12 = vld [vmem:[%s2120_s14 + $0x40] sm:$0xff]  ;;  %p1872_p13 = pneg %p1871_p12  ;;  %p1878_p2 = por %p1877_p1, %p1876_p0 }
  0x26   : > { %v1848_v10 = vld [vmem:[%s2480_s3 + $0x90] sm:$0xff]   ;;  %v1851_v14 = vld [vmem:[%s2480_s3 + $0xd8] sm:$0xff]   ;;  %v243_v15 = vld [vmem:[%s2120_s14 + $0x68] sm:$0xff] }
  0x27   : > { %626 = vmatpush1.bf16.msra.mxu0 %v1805_v26  ;;  %739 = vmatpush1.bf16.msra.mxu1 %v1806_v27  ;;  %v240_v13 = vld [vmem:[%s2120_s14 + $0x50] sm:$0xff]  ;;  %v245_v16 = vld [vmem:[%s2120_s14 + $0x78] sm:$0xff]  ;;  %v1853_v19 = vld [vmem:[%s2480_s3 + $0x60] sm:$0xff]   ;;  %p1879_p3 = pnand %p1878_p2, %p1872_p13 }
  0x28   : > { %627 = vmatprep.subr.bf16.mxu0 %v1807_v28  ;;  %740 = vmatprep.subr.bf16.mxu1 %v1809_v29  ;;  %v1850_v17 = vld [vmem:[%s2480_s3 + $0x18] sm:$0xff]   ;;  %v1855_v20 = vld [vmem:[%s2480_s3 + $0xe0] sm:$0xff]   ;;  %v266_v21 = vpack.c.bf16 %v240_v13, %v238_v12  ;;  %v269_v23 = vpack.c.bf16 %v245_v16, %v243_v15  ;;  %v1857_v25 = vld [vmem:[%s2480_s3 + $0x68] sm:$0xff]  }
  0x29   : > { %v1852_v18 = vld [vmem:[%s2480_s3 + $0x98] sm:$0xff]   ;;  %v1854_v22 = vld [vmem:[%s2480_s3 + $0x20] sm:$0xff]   ;;  %v244_v27 = vld [vmem:[%s2120_s14 + $0x70] sm:$0xff] }
  0x2a   : > { %v1856_v24 = vld [vmem:[%s2480_s3 + $0xa0] sm:$0xff]   ;;  %v1859_v28 = vld [vmem:[%s2480_s3 + $0xe8] sm:$0xff]   ;;  %v1862_v36 = vld [vmem:[%s2480_s3 + $0x30] sm:$0xff]  }
  0x2b   : > { %628 = vmatpush1.bf16.msra.mxu0 %v1811_v30  ;;  %741 = vmatpush1.bf16.msra.mxu1 %v1812_v31  ;;  %v242_v26 = vld [vmem:[%s2120_s14 + $0x60] sm:$0xff]  ;;  %v247_v29 = vld [vmem:[%s2120_s14 + $0x88] sm:$0xff]  ;;  %v249_v30 = vld [vmem:[%s2120_s14 + $0x98] sm:$0xff] }
  0x2c   : > { %629 = vmatprep.subr.bf16.mxu0 %v1813_v32  ;;  %742 = vmatprep.subr.bf16.mxu1 %v1815_v33  ;;  %v1858_v31 = vld [vmem:[%s2480_s3 + $0x28] sm:$0xff]   ;;  %v1861_v33 = vld [vmem:[%s2480_s3 + $0x70] sm:$0xff]   ;;  %v271_v37 = vpack.c.bf16 %v249_v30, %v247_v29  ;;  %v254_v51 = vld [vmem:[%s2120_s14 + $0xc0] sm:$0xff] }
  0x2d   : > { %v1860_v32 = vld [vmem:[%s2480_s3 + $0xa8] sm:$0xff]   ;;  %v248_v40 = vld [vmem:[%s2120_s14 + $0x90] sm:$0xff]  ;;  %v261_v54 = vld [vmem:[%s2120_s14 + $0xf8] sm:$0xff] }
  0x2e   : > { %v256_v52 = vld [vmem:[%s2120_s14 + $0xd0] sm:$0xff]  ;;  %v259_v53 = vld [vmem:[%s2120_s14 + $0xe8] sm:$0xff]  ;;  %v1866_v62 = vld [vmem:[%s2480_s3 + $0x38] sm:$0xff]  }
  0x2f   : > { %630 = vmatpush1.bf16.msra.mxu0 %v1817_v34  ;;  %743 = vmatpush1.bf16.msra.mxu1 %v1818_v35  ;;  %v1863_v34 = vld [vmem:[%s2480_s3 + $0xf0] sm:$0xff]   ;;  %v268_v35 = vpack.c.bf16 %v244_v27, %v242_v26  ;;  %v1868_v63 = vld [vmem:[%s2480_s3 + $0xb8] sm:$0xff]  }
  0x30   : > { %631 = vmatprep.subr.bf16.mxu0 %v1819_v38  ;;  %744 = vmatprep.subr.bf16.mxu1 %v1821_v39  ;;  %v1864_v38 = vld [vmem:[%s2480_s3 + $0xb0] sm:$0xff]   ;;  %v246_v39 = vld [vmem:[%s2120_s14 + $0x80] sm:$0xff] }
  0x33   : > { %632 = vmatpush1.bf16.msra.mxu0 %v1823_v41  ;;  %745 = vmatpush1.bf16.msra.mxu1 %v1824_v42  ;;  %v251_v41 = vld [vmem:[%s2120_s14 + $0xa8] sm:$0xff]  ;;  %v253_v42 = vld [vmem:[%s2120_s14 + $0xb8] sm:$0xff] }
  0x34   : > { %633 = vmatprep.subr.bf16.mxu0 %v1825_v43  ;;  %746 = vmatprep.subr.bf16.mxu1 %v1827_v44  ;;  %v270_v43 = vpack.c.bf16 %v248_v40, %v246_v39  ;;  %v273_v44 = vpack.c.bf16 %v253_v42, %v251_v41 }
  0x37   : > { %634 = vmatpush1.bf16.msra.mxu0 %v1829_v45  ;;  %747 = vmatpush1.bf16.msra.mxu1 %v1830_v46  ;;  %v250_v45 = vld [vmem:[%s2120_s14 + $0xa0] sm:$0xff]  ;;  %v252_v46 = vld [vmem:[%s2120_s14 + $0xb0] sm:$0xff] }
  0x38   : > { %635 = vmatprep.subr.bf16.mxu0 %v1831_v47  ;;  %748 = vmatprep.subr.bf16.mxu1 %v1833_v48  ;;  %v255_v47 = vld [vmem:[%s2120_s14 + $0xc8] sm:$0xff]  ;;  %v257_v48 = vld [vmem:[%s2120_s14 + $0xd8] sm:$0xff] }
  0x3b   : > { %636 = vmatpush1.bf16.msra.mxu0 %v1835_v49  ;;  %749 = vmatpush1.bf16.msra.mxu1 %v1836_v50  ;;  %v272_v49 = vpack.c.bf16 %v252_v46, %v250_v45  ;;  %v275_v50 = vpack.c.bf16 %v257_v48, %v255_v47 }
  0x3c   : > { %1596 = vmatprep.subr.bf16.mxu0 %v1837_v55  ;;  %1660 = vmatprep.subr.bf16.mxu1 %v1839_v56  ;;  %v274_v55 = vpack.c.bf16 %v256_v52, %v254_v51  ;;  %v277_v56 = vpack.c.bf16 %v261_v54, %v259_v53 }
  0x3e   : > { %646 = vmatmul.mubr.bf16.vlgmr.msra.gmra.mrb[0].mxu0 %v262_v57  ;;  %759 = vmatmul.mubr.bf16.vlgmr.msra.gmra.mrb[0].mxu1 %v262_v57  ;;  %v258_v57 = vld [vmem:[%s2120_s14 + $0xe0] sm:$0xff] }
  0x3f   : > { %1541 = vmatprep.mubr.msk.bf16.mxu0 %vm588_vm0, %v265_v59  ;;  %1549 = vmatprep.mubr.msk.bf16.mxu1 %vm588_vm0, %v265_v59 }
  0x40   : > { %1597 = vmatpush3.bf16.msra.mxu0 %v1838_v58  ;;  %1661 = vmatpush3.bf16.msra.mxu1 %v1840_v60  ;;  %v260_v58 = vld [vmem:[%s2120_s14 + $0xf0] sm:$0xff]  ;;  %v1865_v60 = vld [vmem:[%s2480_s3 + $0x78] sm:$0xff]  }
  0x41   : > { %1598 = vmatprep.subr.bf16.mxu0 %v1841_v61  ;;  %1662 = vmatprep.subr.bf16.mxu1 %v1843_v0  ;;  %v276_v59 = vpack.c.bf16 %v260_v58, %v258_v57  ;;  %v1867_v61 = vld [vmem:[%s2480_s3 + $0xf8] sm:$0xff]   ;;  %v328_v0 = vlaneseq }
  0x43   : > { %v329_v1 = vshrl.u32 %v328_v0, 7 }
  0x44   : > { %1599 = vmatpush3.bf16.msra.mxu0 %v1842_v3  ;;  %1663 = vmatpush3.bf16.msra.mxu1 %v1844_v4  ;;  %v326_v4 = vld [vmem:[%s2479_s2] sm:$0xf] }
  0x45   : > { %1600 = vmatprep.subr.bf16.mxu0 %v1845_v5  ;;  %1664 = vmatprep.subr.bf16.mxu1 %v1847_v6  ;;  %v330_v2 = vsub.s32 0, %v329_v1  ;;  %v338_v3 = vsub.s32 2, %v329_v1  ;;  %v334_v5 = vsub.s32 1, %v329_v1  ;;  %v342_v6 = vsub.s32 3, %v329_v1 }
  0x46   : > { %656 = vmatmul.mubr.bf16.gmra.mrb[4].mxu0 %v264_v7  ;;  %769 = vmatmul.mubr.bf16.gmra.mrb[4].mxu1 %v264_v7 }
  0x47   : > { %1542 = vmatprep.mubr.msk.bf16.mxu0 %vm588_vm0, %v267_v9  ;;  %1550 = vmatprep.mubr.msk.bf16.mxu1 %vm588_vm0, %v267_v9  ;;  %v2311_v7 = vrot.slane %v326_v4, %v330_v2  ;;  %v2315_v9 = vrot.slane %v326_v4, %v334_v5 }
  0x48   : > { %1601 = vmatpush3.bf16.msra.mxu0 %v1846_v8  ;;  %1665 = vmatpush3.bf16.msra.mxu1 %v1848_v10  ;;  %v2313_v8 = vrot.slane %v326_v4, %v338_v3  ;;  %v2317_v10 = vrot.slane %v326_v4, %v342_v6 }
  0x49   : > { %1602 = vmatprep.subr.bf16.mxu0 %v1849_v11  ;;  %1666 = vmatprep.subr.bf16.mxu1 %v1851_v14 }
  0x4c   : > { %1603 = vmatpush3.bf16.msra.mxu0 %v1850_v17  ;;  %1667 = vmatpush3.bf16.msra.mxu1 %v1852_v18 }
  0x4d   : > { %1604 = vmatprep.subr.bf16.mxu0 %v1853_v19  ;;  %1668 = vmatprep.subr.bf16.mxu1 %v1855_v20 }
  0x4e   : > { %666 = vmatmul.mubr.bf16.gmra.mrb[8].mxu0 %v266_v21  ;;  %779 = vmatmul.mubr.bf16.gmra.mrb[8].mxu1 %v266_v21 }
  0x4f   : > { %1543 = vmatprep.mubr.msk.bf16.mxu0 %vm588_vm0, %v269_v23  ;;  %1551 = vmatprep.mubr.msk.bf16.mxu1 %vm588_vm0, %v269_v23 }
  0x50   : > { %1605 = vmatpush3.bf16.msra.mxu0 %v1854_v22  ;;  %1669 = vmatpush3.bf16.msra.mxu1 %v1856_v24 }
  0x51   : > { %1606 = vmatprep.subr.bf16.mxu0 %v1857_v25  ;;  %1670 = vmatprep.subr.bf16.mxu1 %v1859_v28 }
  0x54   : > { %1607 = vmatpush3.bf16.msra.mxu0 %v1858_v31  ;;  %1671 = vmatpush3.bf16.msra.mxu1 %v1860_v32 }
  0x55   : > { %1608 = vmatprep.subr.bf16.mxu0 %v1861_v33  ;;  %1672 = vmatprep.subr.bf16.mxu1 %v1863_v34 }
  0x56   : > { %676 = vmatmul.mubr.bf16.gmra.mrb[12].mxu0 %v268_v35  ;;  %789 = vmatmul.mubr.bf16.gmra.mrb[12].mxu1 %v268_v35 }
  0x57   : > { %1544 = vmatprep.mubr.msk.bf16.mxu0 %vm588_vm0, %v271_v37  ;;  %1552 = vmatprep.mubr.msk.bf16.mxu1 %vm588_vm0, %v271_v37 }
  0x58   : > { %1609 = vmatpush3.bf16.msra.mxu0 %v1862_v36  ;;  %1673 = vmatpush3.bf16.msra.mxu1 %v1864_v38 }
  0x59   : > { %1610 = vmatprep.subr.bf16.mxu0 %v1865_v60  ;;  %1674 = vmatprep.subr.bf16.mxu1 %v1867_v61 }
  0x5c   : > { %1611 = vmatpush3.bf16.msra.mxu0 %v1866_v62  ;;  %1675 = vmatpush3.bf16.msra.mxu1 %v1868_v63 }
  0x5e   : > { %686 = vmatmul.mubr.bf16.gmra.mrb[16].mxu0 %v270_v43  ;;  %799 = vmatmul.mubr.bf16.gmra.mrb[16].mxu1 %v270_v43 }
  0x5f   : > { %1545 = vmatprep.mubr.msk.bf16.mxu0 %vm588_vm0, %v273_v44  ;;  %1553 = vmatprep.mubr.msk.bf16.mxu1 %vm588_vm0, %v273_v44 }
  0x66   : > { %696 = vmatmul.mubr.bf16.gmra.mrb[20].mxu0 %v272_v49  ;;  %809 = vmatmul.mubr.bf16.gmra.mrb[20].mxu1 %v272_v49 }
  0x67   : > { %1546 = vmatprep.mubr.msk.bf16.mxu0 %vm588_vm0, %v275_v50  ;;  %1554 = vmatprep.mubr.msk.bf16.mxu1 %vm588_vm0, %v275_v50 }
  0x6e   : > { %706 = vmatmul.mubr.bf16.gmra.mrb[24].mxu0 %v274_v55  ;;  %819 = vmatmul.mubr.bf16.gmra.mrb[24].mxu1 %v274_v55 }
  0x6f   : > { %1547 = vmatprep.mubr.msk.bf16.mxu0 %vm588_vm0, %v277_v56  ;;  %1555 = vmatprep.mubr.msk.bf16.mxu1 %vm588_vm0, %v277_v56 }
  0x76   : > { %716 = vmatmul.mubr.bf16.gmra.mrb[28].mxu0 %v276_v59  ;;  %829 = vmatmul.mubr.bf16.gmra.mrb[28].mxu1 %v276_v59 }
 0x111   : > { %v647_v11 = vpop.f32.mrb[0].mxu0  ;;  %v760_v12 = vpop.f32.mrb[0].mxu1 }
 0x112   : > { %v648_v13 = vadd.f32 %v647_v11, %v2311_v7  ;;  %v761_v14 = vadd.f32 %v760_v12, %v2313_v8  ;;  %v649_v15 = vpop.f32.mrb[1].mxu0  ;;  %v762_v16 = vpop.f32.mrb[1].mxu1 }
 0x113   : > { %v650_v17 = vadd.f32 %v649_v15, %v2315_v9  ;;  %v763_v18 = vadd.f32 %v762_v16, %v2317_v10  ;;  %v651_v19 = vpop.f32.mrb[2].mxu0  ;;  %v764_v20 = vpop.f32.mrb[2].mxu1 }
 0x114   : > { %v841_v21 = vmax.f32 %v761_v14, 0.0  ;;  %v652_v22 = vadd.f32 %v651_v19, %v2311_v7  ;;  %v765_v23 = vadd.f32 %v764_v20, %v2313_v8  ;;  %v653_v24 = vpop.f32.mrb[3].mxu0  ;;  %v766_v25 = vpop.f32.mrb[3].mxu1  ;;  %v839_v29 = vmax.f32 %v648_v13, 0.0 }
 0x115   : > { %v842_v26 = vmax.f32 %v763_v18, 0.0  ;;  %v654_v27 = vadd.f32 %v653_v24, %v2315_v9  ;;  %v767_v28 = vadd.f32 %v766_v25, %v2317_v10  ;;  %v840_v32 = vmax.f32 %v650_v17, 0.0 }
 0x116   : > { %v843_v30 = vmax.f32 %v652_v22, 0.0  ;;  %v845_v31 = vmax.f32 %v765_v23, 0.0 }
 0x117   : > { %v844_v33 = vmax.f32 %v654_v27, 0.0  ;;  %v846_v34 = vmax.f32 %v767_v28, 0.0 }
 0x118   : > { %v903_v35 = vpack.c.bf16 %v843_v30, %v839_v29  ;;  %v905_v36 = vpack.c.bf16 %v845_v31, %v841_v21 }
 0x119   : > { %v904_v37 = vpack.c.bf16 %v844_v33, %v840_v32  ;;  %v906_v38 = vpack.c.bf16 %v846_v34, %v842_v26  ;;  %v657_v39 = vpop.f32.mrb[4].mxu0  ;;  %v770_v40 = vpop.f32.mrb[4].mxu1 }
 0x11a   : > { %v658_v41 = vadd.f32 %v657_v39, %v2311_v7  ;;  %v771_v42 = vadd.f32 %v770_v40, %v2313_v8  ;;  %v659_v43 = vpop.f32.mrb[5].mxu0  ;;  %v772_v44 = vpop.f32.mrb[5].mxu1 }
 0x11b   : > { %v660_v45 = vadd.f32 %v659_v43, %v2315_v9  ;;  %v773_v46 = vadd.f32 %v772_v44, %v2317_v10  ;;  %v661_v47 = vpop.f32.mrb[6].mxu0  ;;  %v774_v48 = vpop.f32.mrb[6].mxu1  ;;  %1230 = vmatprep.mubr.bf16.mxu0 %v904_v37  ;;  %1327 = vmatprep.mubr.bf16.mxu1 %v906_v38 }
 0x11c   : > { %v849_v49 = vmax.f32 %v771_v42, 0.0  ;;  %v662_v50 = vadd.f32 %v661_v47, %v2311_v7  ;;  %v775_v51 = vadd.f32 %v774_v48, %v2313_v8  ;;  %v663_v52 = vpop.f32.mrb[7].mxu0  ;;  %v776_v53 = vpop.f32.mrb[7].mxu1  ;;  %1231 = vmatmul.mubr.bf16.vlgmr.msra.gmra.mrb[32].mxu0 %v903_v35  ;;  %1328 = vmatmul.mubr.bf16.vlgmr.msra.gmra.mrb[32].mxu1 %v905_v36  ;;  %v847_v57 = vmax.f32 %v658_v41, 0.0 }
 0x11d   : > { %v850_v54 = vmax.f32 %v773_v46, 0.0  ;;  %v664_v55 = vadd.f32 %v663_v52, %v2315_v9  ;;  %v777_v56 = vadd.f32 %v776_v53, %v2317_v10  ;;  %v848_v60 = vmax.f32 %v660_v45, 0.0 }
 0x11e   : > { %v851_v58 = vmax.f32 %v662_v50, 0.0  ;;  %v853_v59 = vmax.f32 %v775_v51, 0.0 }
 0x11f   : > { %v852_v61 = vmax.f32 %v664_v55, 0.0  ;;  %v854_v62 = vmax.f32 %v777_v56, 0.0 }
 0x120   : > { %v907_v63 = vpack.c.bf16 %v851_v58, %v847_v57  ;;  %v909_v0 = vpack.c.bf16 %v853_v59, %v849_v49 }
 0x121   : > { %v908_v1 = vpack.c.bf16 %v852_v61, %v848_v60  ;;  %v910_v2 = vpack.c.bf16 %v854_v62, %v850_v54  ;;  %v667_v3 = vpop.f32.mrb[8].mxu0  ;;  %v780_v4 = vpop.f32.mrb[8].mxu1 }
 0x122   : > { %v668_v5 = vadd.f32 %v667_v3, %v2311_v7  ;;  %v781_v6 = vadd.f32 %v780_v4, %v2313_v8  ;;  %v669_v11 = vpop.f32.mrb[9].mxu0  ;;  %v782_v12 = vpop.f32.mrb[9].mxu1 }
 0x123   : > { %v670_v13 = vadd.f32 %v669_v11, %v2315_v9  ;;  %v783_v14 = vadd.f32 %v782_v12, %v2317_v10  ;;  %v671_v15 = vpop.f32.mrb[10].mxu0  ;;  %v784_v16 = vpop.f32.mrb[10].mxu1  ;;  %1238 = vmatprep.mubr.bf16.mxu0 %v908_v1  ;;  %1335 = vmatprep.mubr.bf16.mxu1 %v910_v2 }
 0x124   : > { %v857_v17 = vmax.f32 %v781_v6, 0.0  ;;  %v672_v18 = vadd.f32 %v671_v15, %v2311_v7  ;;  %v785_v19 = vadd.f32 %v784_v16, %v2313_v8  ;;  %v673_v20 = vpop.f32.mrb[11].mxu0  ;;  %v786_v21 = vpop.f32.mrb[11].mxu1  ;;  %1239 = vmatmul.mubr.bf16.gmra.mrb[36].mxu0 %v907_v63  ;;  %1336 = vmatmul.mubr.bf16.gmra.mrb[36].mxu1 %v909_v0  ;;  %v855_v25 = vmax.f32 %v668_v5, 0.0 }
 0x125   : > { %v858_v22 = vmax.f32 %v783_v14, 0.0  ;;  %v674_v23 = vadd.f32 %v673_v20, %v2315_v9  ;;  %v787_v24 = vadd.f32 %v786_v21, %v2317_v10  ;;  %v856_v28 = vmax.f32 %v670_v13, 0.0 }
 0x126   : > { %v859_v26 = vmax.f32 %v672_v18, 0.0  ;;  %v861_v27 = vmax.f32 %v785_v19, 0.0 }
 0x127   : > { %v860_v29 = vmax.f32 %v674_v23, 0.0  ;;  %v862_v30 = vmax.f32 %v787_v24, 0.0 }
 0x128   : > { %v911_v31 = vpack.c.bf16 %v859_v26, %v855_v25  ;;  %v913_v32 = vpack.c.bf16 %v861_v27, %v857_v17 }
 0x129   : > { %v912_v33 = vpack.c.bf16 %v860_v29, %v856_v28  ;;  %v914_v34 = vpack.c.bf16 %v862_v30, %v858_v22  ;;  %v677_v35 = vpop.f32.mrb[12].mxu0  ;;  %v790_v36 = vpop.f32.mrb[12].mxu1 }
 0x12a   : > { %v678_v37 = vadd.f32 %v677_v35, %v2311_v7  ;;  %v791_v38 = vadd.f32 %v790_v36, %v2313_v8  ;;  %v679_v39 = vpop.f32.mrb[13].mxu0  ;;  %v792_v40 = vpop.f32.mrb[13].mxu1 }
 0x12b   : > { %v680_v41 = vadd.f32 %v679_v39, %v2315_v9  ;;  %v793_v42 = vadd.f32 %v792_v40, %v2317_v10  ;;  %v681_v43 = vpop.f32.mrb[14].mxu0  ;;  %v794_v44 = vpop.f32.mrb[14].mxu1  ;;  %1246 = vmatprep.mubr.bf16.mxu0 %v912_v33  ;;  %1343 = vmatprep.mubr.bf16.mxu1 %v914_v34 }
 0x12c   : > { %v865_v45 = vmax.f32 %v791_v38, 0.0  ;;  %v682_v46 = vadd.f32 %v681_v43, %v2311_v7  ;;  %v795_v47 = vadd.f32 %v794_v44, %v2313_v8  ;;  %v683_v48 = vpop.f32.mrb[15].mxu0  ;;  %v796_v49 = vpop.f32.mrb[15].mxu1  ;;  %1247 = vmatmul.mubr.bf16.gmra.mrb[40].mxu0 %v911_v31  ;;  %1344 = vmatmul.mubr.bf16.gmra.mrb[40].mxu1 %v913_v32  ;;  %v863_v53 = vmax.f32 %v678_v37, 0.0 }
 0x12d   : > { %v866_v50 = vmax.f32 %v793_v42, 0.0  ;;  %v684_v51 = vadd.f32 %v683_v48, %v2315_v9  ;;  %v797_v52 = vadd.f32 %v796_v49, %v2317_v10  ;;  %v864_v56 = vmax.f32 %v680_v41, 0.0 }
 0x12e   : > { %v867_v54 = vmax.f32 %v682_v46, 0.0  ;;  %v869_v55 = vmax.f32 %v795_v47, 0.0 }
 0x12f   : > { %v868_v57 = vmax.f32 %v684_v51, 0.0  ;;  %v870_v58 = vmax.f32 %v797_v52, 0.0 }
 0x130   : > { %v915_v59 = vpack.c.bf16 %v867_v54, %v863_v53  ;;  %v917_v60 = vpack.c.bf16 %v869_v55, %v865_v45 }
 0x131   : > { %v916_v61 = vpack.c.bf16 %v868_v57, %v864_v56  ;;  %v918_v62 = vpack.c.bf16 %v870_v58, %v866_v50  ;;  %v687_v63 = vpop.f32.mrb[16].mxu0  ;;  %v800_v0 = vpop.f32.mrb[16].mxu1 }
 0x132   : > { %v688_v1 = vadd.f32 %v687_v63, %v2311_v7  ;;  %v801_v2 = vadd.f32 %v800_v0, %v2313_v8  ;;  %v689_v3 = vpop.f32.mrb[17].mxu0  ;;  %v802_v4 = vpop.f32.mrb[17].mxu1 }
 0x133   : > { %v690_v5 = vadd.f32 %v689_v3, %v2315_v9  ;;  %v803_v6 = vadd.f32 %v802_v4, %v2317_v10  ;;  %v691_v11 = vpop.f32.mrb[18].mxu0  ;;  %v804_v12 = vpop.f32.mrb[18].mxu1  ;;  %1254 = vmatprep.mubr.bf16.mxu0 %v916_v61  ;;  %1351 = vmatprep.mubr.bf16.mxu1 %v918_v62 }
 0x134   : > { %v873_v13 = vmax.f32 %v801_v2, 0.0  ;;  %v692_v14 = vadd.f32 %v691_v11, %v2311_v7  ;;  %v805_v15 = vadd.f32 %v804_v12, %v2313_v8  ;;  %v693_v16 = vpop.f32.mrb[19].mxu0  ;;  %v806_v17 = vpop.f32.mrb[19].mxu1  ;;  %1255 = vmatmul.mubr.bf16.gmra.mrb[44].mxu0 %v915_v59  ;;  %1352 = vmatmul.mubr.bf16.gmra.mrb[44].mxu1 %v917_v60  ;;  %v871_v21 = vmax.f32 %v688_v1, 0.0 }
 0x135   : > { %v874_v18 = vmax.f32 %v803_v6, 0.0  ;;  %v694_v19 = vadd.f32 %v693_v16, %v2315_v9  ;;  %v807_v20 = vadd.f32 %v806_v17, %v2317_v10  ;;  %v872_v24 = vmax.f32 %v690_v5, 0.0 }
 0x136   : > { %v875_v22 = vmax.f32 %v692_v14, 0.0  ;;  %v877_v23 = vmax.f32 %v805_v15, 0.0 }
 0x137   : > { %v876_v25 = vmax.f32 %v694_v19, 0.0  ;;  %v878_v26 = vmax.f32 %v807_v20, 0.0 }
 0x138   : > { %v919_v27 = vpack.c.bf16 %v875_v22, %v871_v21  ;;  %v921_v28 = vpack.c.bf16 %v877_v23, %v873_v13 }
 0x139   : > { %v920_v29 = vpack.c.bf16 %v876_v25, %v872_v24  ;;  %v922_v30 = vpack.c.bf16 %v878_v26, %v874_v18  ;;  %v697_v31 = vpop.f32.mrb[20].mxu0  ;;  %v810_v32 = vpop.f32.mrb[20].mxu1 }
 0x13a   : > { %v698_v33 = vadd.f32 %v697_v31, %v2311_v7  ;;  %v811_v34 = vadd.f32 %v810_v32, %v2313_v8  ;;  %v699_v35 = vpop.f32.mrb[21].mxu0  ;;  %v812_v36 = vpop.f32.mrb[21].mxu1 }
 0x13b   : > { %v700_v37 = vadd.f32 %v699_v35, %v2315_v9  ;;  %v813_v38 = vadd.f32 %v812_v36, %v2317_v10  ;;  %v701_v39 = vpop.f32.mrb[22].mxu0  ;;  %v814_v40 = vpop.f32.mrb[22].mxu1  ;;  %1262 = vmatprep.mubr.bf16.mxu0 %v920_v29  ;;  %1359 = vmatprep.mubr.bf16.mxu1 %v922_v30 }
 0x13c   : > { %v881_v41 = vmax.f32 %v811_v34, 0.0  ;;  %v702_v42 = vadd.f32 %v701_v39, %v2311_v7  ;;  %v815_v43 = vadd.f32 %v814_v40, %v2313_v8  ;;  %v703_v44 = vpop.f32.mrb[23].mxu0  ;;  %v816_v45 = vpop.f32.mrb[23].mxu1  ;;  %1263 = vmatmul.mubr.bf16.gmra.mrb[48].mxu0 %v919_v27  ;;  %1360 = vmatmul.mubr.bf16.gmra.mrb[48].mxu1 %v921_v28  ;;  %v879_v49 = vmax.f32 %v698_v33, 0.0 }
 0x13d   : > { %v882_v46 = vmax.f32 %v813_v38, 0.0  ;;  %v704_v47 = vadd.f32 %v703_v44, %v2315_v9  ;;  %v817_v48 = vadd.f32 %v816_v45, %v2317_v10  ;;  %v880_v52 = vmax.f32 %v700_v37, 0.0 }
 0x13e   : > { %v883_v50 = vmax.f32 %v702_v42, 0.0  ;;  %v885_v51 = vmax.f32 %v815_v43, 0.0 }
 0x13f   : > { %v884_v53 = vmax.f32 %v704_v47, 0.0  ;;  %v886_v54 = vmax.f32 %v817_v48, 0.0 }
 0x140   : > { %v923_v55 = vpack.c.bf16 %v883_v50, %v879_v49  ;;  %v925_v56 = vpack.c.bf16 %v885_v51, %v881_v41 }
 0x141   : > { %v924_v57 = vpack.c.bf16 %v884_v53, %v880_v52  ;;  %v926_v58 = vpack.c.bf16 %v886_v54, %v882_v46  ;;  %v707_v59 = vpop.f32.mrb[24].mxu0  ;;  %v820_v60 = vpop.f32.mrb[24].mxu1 }
 0x142   : > { %v708_v61 = vadd.f32 %v707_v59, %v2311_v7  ;;  %v821_v62 = vadd.f32 %v820_v60, %v2313_v8  ;;  %v709_v63 = vpop.f32.mrb[25].mxu0  ;;  %v822_v0 = vpop.f32.mrb[25].mxu1 }
 0x143   : > { %v710_v1 = vadd.f32 %v709_v63, %v2315_v9  ;;  %v823_v2 = vadd.f32 %v822_v0, %v2317_v10  ;;  %v711_v3 = vpop.f32.mrb[26].mxu0  ;;  %v824_v4 = vpop.f32.mrb[26].mxu1  ;;  %1270 = vmatprep.mubr.bf16.mxu0 %v924_v57  ;;  %1367 = vmatprep.mubr.bf16.mxu1 %v926_v58 }
 0x144   : > { %v889_v5 = vmax.f32 %v821_v62, 0.0  ;;  %v712_v6 = vadd.f32 %v711_v3, %v2311_v7  ;;  %v825_v11 = vadd.f32 %v824_v4, %v2313_v8  ;;  %v713_v12 = vpop.f32.mrb[27].mxu0  ;;  %v826_v13 = vpop.f32.mrb[27].mxu1  ;;  %1271 = vmatmul.mubr.bf16.gmra.mrb[52].mxu0 %v923_v55  ;;  %1368 = vmatmul.mubr.bf16.gmra.mrb[52].mxu1 %v925_v56  ;;  %v887_v17 = vmax.f32 %v708_v61, 0.0 }
 0x145   : > { %v890_v14 = vmax.f32 %v823_v2, 0.0  ;;  %v714_v15 = vadd.f32 %v713_v12, %v2315_v9  ;;  %v827_v16 = vadd.f32 %v826_v13, %v2317_v10  ;;  %v888_v20 = vmax.f32 %v710_v1, 0.0 }
 0x146   : > { %v891_v18 = vmax.f32 %v712_v6, 0.0  ;;  %v893_v19 = vmax.f32 %v825_v11, 0.0 }
 0x147   : > { %v892_v21 = vmax.f32 %v714_v15, 0.0  ;;  %v894_v22 = vmax.f32 %v827_v16, 0.0 }
 0x148   : > { %v927_v23 = vpack.c.bf16 %v891_v18, %v887_v17  ;;  %v929_v24 = vpack.c.bf16 %v893_v19, %v889_v5 }
 0x149   : > { %v928_v25 = vpack.c.bf16 %v892_v21, %v888_v20  ;;  %v930_v26 = vpack.c.bf16 %v894_v22, %v890_v14  ;;  %v717_v27 = vpop.f32.mrb[28].mxu0  ;;  %v830_v28 = vpop.f32.mrb[28].mxu1 }
 0x14a   : > { %v718_v29 = vadd.f32 %v717_v27, %v2311_v7  ;;  %v831_v30 = vadd.f32 %v830_v28, %v2313_v8  ;;  %v719_v31 = vpop.f32.mrb[29].mxu0  ;;  %v832_v32 = vpop.f32.mrb[29].mxu1 }
 0x14b   : > { %v720_v33 = vadd.f32 %v719_v31, %v2315_v9  ;;  %v833_v34 = vadd.f32 %v832_v32, %v2317_v10  ;;  %v721_v35 = vpop.f32.mrb[30].mxu0  ;;  %v834_v36 = vpop.f32.mrb[30].mxu1  ;;  %1278 = vmatprep.mubr.bf16.mxu0 %v928_v25  ;;  %1375 = vmatprep.mubr.bf16.mxu1 %v930_v26 }
 0x14c   : > { %v897_v37 = vmax.f32 %v831_v30, 0.0  ;;  %v722_v38 = vadd.f32 %v721_v35, %v2311_v7  ;;  %v835_v39 = vadd.f32 %v834_v36, %v2313_v8  ;;  %v723_v40 = vpop.f32.mrb[31].mxu0  ;;  %v836_v41 = vpop.f32.mrb[31].mxu1  ;;  %1279 = vmatmul.mubr.bf16.gmra.mrb[56].mxu0 %v927_v23  ;;  %1376 = vmatmul.mubr.bf16.gmra.mrb[56].mxu1 %v929_v24  ;;  %v895_v45 = vmax.f32 %v718_v29, 0.0 }
 0x14d   : > { %v898_v42 = vmax.f32 %v833_v34, 0.0  ;;  %v724_v43 = vadd.f32 %v723_v40, %v2315_v9  ;;  %v837_v44 = vadd.f32 %v836_v41, %v2317_v10  ;;  %v896_v48 = vmax.f32 %v720_v33, 0.0  ;;  %v2387_v10 = vld [vmem:[%s2481_s4] ss:$0 sm:$0xff] }
 0x14e   : > { %v899_v46 = vmax.f32 %v722_v38, 0.0  ;;  %v901_v47 = vmax.f32 %v835_v39, 0.0 }
 0x14f   : > { %v900_v49 = vmax.f32 %v724_v43, 0.0  ;;  %v902_v50 = vmax.f32 %v837_v44, 0.0 }
 0x150   : > { %v931_v7 = vpack.c.bf16 %v899_v46, %v895_v45  ;;  %v933_v51 = vpack.c.bf16 %v901_v47, %v897_v37 }
 0x151   : > { %v932_v8 = vpack.c.bf16 %v900_v49, %v896_v48  ;;  %v934_v52 = vpack.c.bf16 %v902_v50, %v898_v42 }
 0x153   : > { %1286 = vmatprep.mubr.bf16.mxu0 %v932_v8  ;;  %1383 = vmatprep.mubr.bf16.mxu1 %v934_v52 }
 0x154   : > { %1287 = vmatmul.mubr.bf16.gmra.mrb[60].mxu0 %v931_v7  ;;  %1384 = vmatmul.mubr.bf16.gmra.mrb[60].mxu1 %v933_v51 }
 0x1ef   : > { %v1612_v9 = vpop.f32.mrb[32].mxu0  ;;  %v1676_v53 = vpop.f32.mrb[32].mxu1 }
 0x1f0   : > { %v1613_v54 = vpop.f32.mrb[33].mxu0  ;;  %v1677_v55 = vpop.f32.mrb[33].mxu1 }
 0x1f1   : > { %v1614_v56 = vadd.f32 %v1613_v54, %v1612_v9  ;;  %v1678_v57 = vadd.f32 %v1677_v55, %v1676_v53  ;;  %v1615_v58 = vpop.f32.mrb[34].mxu0  ;;  %v1679_v59 = vpop.f32.mrb[34].mxu1 }
 0x1f2   : > { %v1616_v60 = vpop.f32.mrb[35].mxu0  ;;  %v1680_v61 = vpop.f32.mrb[35].mxu1 }
 0x1f3   : > { %v1233_v62 = vadd.f32 %v1614_v56, %v2387_v10  ;;  %v1617_v63 = vadd.f32 %v1616_v60, %v1615_v58  ;;  %v1681_v0 = vadd.f32 %v1680_v61, %v1679_v59 }
 0x1f5   : > { %v1330_v1 = vadd.f32 %v1678_v57, %v1233_v62  ;;  %v1236_v2 = vadd.f32 %v1617_v63, %v2387_v10 }
 0x1f7   : > { %1392 = vst [vmem:[%s2393_s6] sm:$0xff] %v1330_v1  ;;  %v1333_v3 = vadd.f32 %v1681_v0, %v1236_v2  ;;  %v1618_v4 = vpop.f32.mrb[36].mxu0  ;;  %v1682_v5 = vpop.f32.mrb[36].mxu1 }
 0x1f8   : > { %v1619_v6 = vpop.f32.mrb[37].mxu0  ;;  %v1683_v11 = vpop.f32.mrb[37].mxu1 }
 0x1f9   : > { %1393 = vst [vmem:[%s2393_s6 + $0x8] sm:$0xff] %v1333_v3  ;;  %v1620_v12 = vadd.f32 %v1619_v6, %v1618_v4  ;;  %v1684_v13 = vadd.f32 %v1683_v11, %v1682_v5  ;;  %v1621_v14 = vpop.f32.mrb[38].mxu0  ;;  %v1685_v15 = vpop.f32.mrb[38].mxu1 }
 0x1fa   : > { %v1622_v16 = vpop.f32.mrb[39].mxu0  ;;  %v1686_v17 = vpop.f32.mrb[39].mxu1 }
 0x1fb   : > { %v1241_v18 = vadd.f32 %v1620_v12, %v2387_v10  ;;  %v1623_v19 = vadd.f32 %v1622_v16, %v1621_v14  ;;  %v1687_v20 = vadd.f32 %v1686_v17, %v1685_v15 }
 0x1fd   : > { %v1338_v21 = vadd.f32 %v1684_v13, %v1241_v18  ;;  %v1244_v22 = vadd.f32 %v1623_v19, %v2387_v10 }
 0x1ff   : > { %1394 = vst [vmem:[%s2393_s6 + $0x10] sm:$0xff] %v1338_v21  ;;  %v1341_v23 = vadd.f32 %v1687_v20, %v1244_v22  ;;  %v1624_v24 = vpop.f32.mrb[40].mxu0  ;;  %v1688_v25 = vpop.f32.mrb[40].mxu1 }
 0x200   : > { %v1625_v26 = vpop.f32.mrb[41].mxu0  ;;  %v1689_v27 = vpop.f32.mrb[41].mxu1 }
 0x201   : > { %1395 = vst [vmem:[%s2393_s6 + $0x18] sm:$0xff] %v1341_v23  ;;  %v1626_v28 = vadd.f32 %v1625_v26, %v1624_v24  ;;  %v1690_v29 = vadd.f32 %v1689_v27, %v1688_v25  ;;  %v1627_v30 = vpop.f32.mrb[42].mxu0  ;;  %v1691_v31 = vpop.f32.mrb[42].mxu1 }
 0x202   : > { %v1628_v32 = vpop.f32.mrb[43].mxu0  ;;  %v1692_v33 = vpop.f32.mrb[43].mxu1 }
 0x203   : > { %v1249_v34 = vadd.f32 %v1626_v28, %v2387_v10  ;;  %v1629_v35 = vadd.f32 %v1628_v32, %v1627_v30  ;;  %v1693_v36 = vadd.f32 %v1692_v33, %v1691_v31 }
 0x205   : > { %v1346_v37 = vadd.f32 %v1690_v29, %v1249_v34  ;;  %v1252_v38 = vadd.f32 %v1629_v35, %v2387_v10 }
 0x207   : > { %1396 = vst [vmem:[%s2393_s6 + $0x20] sm:$0xff] %v1346_v37  ;;  %v1349_v39 = vadd.f32 %v1693_v36, %v1252_v38  ;;  %v1630_v40 = vpop.f32.mrb[44].mxu0  ;;  %v1694_v41 = vpop.f32.mrb[44].mxu1 }
 0x208   : > { %v1631_v42 = vpop.f32.mrb[45].mxu0  ;;  %v1695_v43 = vpop.f32.mrb[45].mxu1 }
 0x209   : > { %1397 = vst [vmem:[%s2393_s6 + $0x28] sm:$0xff] %v1349_v39  ;;  %v1632_v44 = vadd.f32 %v1631_v42, %v1630_v40  ;;  %v1696_v45 = vadd.f32 %v1695_v43, %v1694_v41  ;;  %v1633_v46 = vpop.f32.mrb[46].mxu0  ;;  %v1697_v47 = vpop.f32.mrb[46].mxu1 }
 0x20a   : > { %v1634_v48 = vpop.f32.mrb[47].mxu0  ;;  %v1698_v49 = vpop.f32.mrb[47].mxu1 }
 0x20b   : > { %v1257_v50 = vadd.f32 %v1632_v44, %v2387_v10  ;;  %v1635_v7 = vadd.f32 %v1634_v48, %v1633_v46  ;;  %v1699_v51 = vadd.f32 %v1698_v49, %v1697_v47 }
 0x20d   : > { %v1354_v8 = vadd.f32 %v1696_v45, %v1257_v50  ;;  %v1260_v52 = vadd.f32 %v1635_v7, %v2387_v10 }
 0x20f   : > { %1398 = vst [vmem:[%s2393_s6 + $0x30] sm:$0xff] %v1354_v8  ;;  %v1357_v9 = vadd.f32 %v1699_v51, %v1260_v52  ;;  %v1636_v53 = vpop.f32.mrb[48].mxu0  ;;  %v1700_v54 = vpop.f32.mrb[48].mxu1 }
 0x210   : > { %v1637_v55 = vpop.f32.mrb[49].mxu0  ;;  %v1701_v56 = vpop.f32.mrb[49].mxu1 }
 0x211   : > { %1399 = vst [vmem:[%s2393_s6 + $0x38] sm:$0xff] %v1357_v9  ;;  %v1638_v57 = vadd.f32 %v1637_v55, %v1636_v53  ;;  %v1702_v58 = vadd.f32 %v1701_v56, %v1700_v54  ;;  %v1639_v59 = vpop.f32.mrb[50].mxu0  ;;  %v1703_v60 = vpop.f32.mrb[50].mxu1 }
 0x212   : > { %v1640_v61 = vpop.f32.mrb[51].mxu0  ;;  %v1704_v62 = vpop.f32.mrb[51].mxu1 }
 0x213   : > { %v1265_v63 = vadd.f32 %v1638_v57, %v2387_v10  ;;  %v1641_v0 = vadd.f32 %v1640_v61, %v1639_v59  ;;  %v1705_v1 = vadd.f32 %v1704_v62, %v1703_v60 }
 0x215   : > { %v1362_v2 = vadd.f32 %v1702_v58, %v1265_v63  ;;  %v1268_v3 = vadd.f32 %v1641_v0, %v2387_v10 }
 0x217   : > { %1400 = vst [vmem:[%s2393_s6 + $0x40] sm:$0xff] %v1362_v2  ;;  %v1365_v4 = vadd.f32 %v1705_v1, %v1268_v3  ;;  %v1642_v5 = vpop.f32.mrb[52].mxu0  ;;  %v1706_v6 = vpop.f32.mrb[52].mxu1 }
 0x218   : > { %v1643_v11 = vpop.f32.mrb[53].mxu0  ;;  %v1707_v12 = vpop.f32.mrb[53].mxu1 }
 0x219   : > { %1401 = vst [vmem:[%s2393_s6 + $0x48] sm:$0xff] %v1365_v4  ;;  %v1644_v13 = vadd.f32 %v1643_v11, %v1642_v5  ;;  %v1708_v14 = vadd.f32 %v1707_v12, %v1706_v6  ;;  %v1645_v15 = vpop.f32.mrb[54].mxu0  ;;  %v1709_v16 = vpop.f32.mrb[54].mxu1 }
 0x21a   : > { %v1646_v17 = vpop.f32.mrb[55].mxu0  ;;  %v1710_v18 = vpop.f32.mrb[55].mxu1 }
 0x21b   : > { %v1273_v19 = vadd.f32 %v1644_v13, %v2387_v10  ;;  %v1647_v20 = vadd.f32 %v1646_v17, %v1645_v15  ;;  %v1711_v21 = vadd.f32 %v1710_v18, %v1709_v16 }
 0x21d   : > { %v1370_v22 = vadd.f32 %v1708_v14, %v1273_v19  ;;  %v1276_v23 = vadd.f32 %v1647_v20, %v2387_v10 }
 0x21f   : > { %1402 = vst [vmem:[%s2393_s6 + $0x50] sm:$0xff] %v1370_v22  ;;  %v1373_v24 = vadd.f32 %v1711_v21, %v1276_v23  ;;  %v1648_v25 = vpop.f32.mrb[56].mxu0  ;;  %v1712_v26 = vpop.f32.mrb[56].mxu1 }
 0x220   : > { %v1649_v27 = vpop.f32.mrb[57].mxu0  ;;  %v1713_v28 = vpop.f32.mrb[57].mxu1 }
 0x221   : > { %1403 = vst [vmem:[%s2393_s6 + $0x58] sm:$0xff] %v1373_v24  ;;  %v1650_v29 = vadd.f32 %v1649_v27, %v1648_v25  ;;  %v1714_v30 = vadd.f32 %v1713_v28, %v1712_v26  ;;  %v1651_v31 = vpop.f32.mrb[58].mxu0  ;;  %v1715_v32 = vpop.f32.mrb[58].mxu1 }
 0x222   : > { %v1652_v33 = vpop.f32.mrb[59].mxu0  ;;  %v1716_v34 = vpop.f32.mrb[59].mxu1 }
 0x223   : > { %v1281_v35 = vadd.f32 %v1650_v29, %v2387_v10  ;;  %v1653_v36 = vadd.f32 %v1652_v33, %v1651_v31  ;;  %v1717_v37 = vadd.f32 %v1716_v34, %v1715_v32 }
 0x225   : > { %v1378_v38 = vadd.f32 %v1714_v30, %v1281_v35  ;;  %v1284_v39 = vadd.f32 %v1653_v36, %v2387_v10 }
 0x227   : > { %1404 = vst [vmem:[%s2393_s6 + $0x60] sm:$0xff] %v1378_v38  ;;  %v1381_v40 = vadd.f32 %v1717_v37, %v1284_v39  ;;  %v1654_v41 = vpop.f32.mrb[60].mxu0  ;;  %v1718_v42 = vpop.f32.mrb[60].mxu1 }
 0x228   : > { %v1655_v43 = vpop.f32.mrb[61].mxu0  ;;  %v1719_v44 = vpop.f32.mrb[61].mxu1 }
 0x229   : > { %1405 = vst [vmem:[%s2393_s6 + $0x68] sm:$0xff] %v1381_v40  ;;  %v1656_v45 = vadd.f32 %v1655_v43, %v1654_v41  ;;  %v1720_v46 = vadd.f32 %v1719_v44, %v1718_v42  ;;  %v1657_v47 = vpop.f32.mrb[62].mxu0  ;;  %v1721_v48 = vpop.f32.mrb[62].mxu1 }
 0x22a   : > { %v1658_v49 = vpop.f32.mrb[63].mxu0  ;;  %v1722_v50 = vpop.f32.mrb[63].mxu1 }
 0x22b   : > { %v1289_v7 = vadd.f32 %v1656_v45, %v2387_v10  ;;  %v1659_v51 = vadd.f32 %v1658_v49, %v1657_v47  ;;  %v1723_v8 = vadd.f32 %v1722_v50, %v1721_v48 }
 0x22d   : > { %v1386_v52 = vadd.f32 %v1720_v46, %v1289_v7  ;;  %v1292_v9 = vadd.f32 %v1659_v51, %v2387_v10 }
 0x22f   : > { %1406 = vst [vmem:[%s2393_s6 + $0x70] sm:$0xff] %v1386_v52  ;;  %v1389_v53 = vadd.f32 %v1723_v8, %v1292_v9 }
 0x231   : > { %1407 = vst [vmem:[%s2393_s6 + $0x78] sm:$0xff] %v1389_v53 }
 0x232   : > { %1882 = shalt.err (!%p1879_p3)
}
 0x233   : > { %s1883_s14 = scalar_lea.hbm %s2428_s11, 2048  ;;  %s1887_s26 = scalar_lea.hbm %s2482_s5, 4096 }
 0x234   : > { %p1884_p4 = scmp.ne.s32.totalorder %s2428_s11, %s1883_s14  ;;  %p1888_p9 = scmp.lt.u32.totalorder %s2428_s11, %s2482_s5 }
 0x235   : > { %p1889_p10 = scmp.lt.u32.totalorder %s1887_s26, %s1883_s14  ;;  %p1891_p12 = scmp.lt.u32.totalorder %s1883_s14, %s2428_s11 }
 0x236   : > { %p1885_p7 = pnand %p1884_p4, %p2004_p5 }
 0x237   : > { %p1890_p11 = por %p1889_p10, %p1888_p9 }
 0x238   : > { %p1886_p8 = pneg %p1885_p7 }
 0x239   : > { %p1892_p13 = por %p1891_p12, %p1890_p11 }
 0x23b   : > { %p1893_p0 = pnand %p1892_p13, %p1886_p8 }
 0x23d   : > { %1896 = shalt.err (!%p1893_p0)
}
 0x23e   : > { %s1934_s6 = smov 128   ;;  %s1935_s7 = smov 8  }
 0x23f   : > { %1724 = dma.vmem_to_hbm [thread:$0]  (%p2004_p5), %s2430_s8, 2048, %s2428_s11, %s2436_s13, %s1934_s6, %s1934_s6, %s1935_s7  }
 0x240 PF: > { %p1730_p1 = scmp.ge.s32.totalorder %s1931_s21, 2  ;;  %s1437_s9 = sand.u32 1, %s1919_s18  }
 0x241   : > { %s1438_s10 = scalar_lea.sflag [#allocation3], %s1437_s9 }
 0x242   : > { %p1727_p2 = pnand %p1730_p1, %p2008_p6 }
 0x244   : > { %1914 = dma.done.wait (!%p1727_p2), %s1438_s10, 2048  }
 0x245   : > { %1916 = vsyncadd (!%p1727_p2), %s1438_s10, 4294965248  ;;  %p15_p3 = scmp.ge.s32.totalorder %s1991_s24, 4   ;;  %s2485_s18 = smov %s1923_s19 }
 0x246   : > { %s2486_s19 = smov %s1927_s20  ;;  %s2487_s20 = smov %s2002_s27 }
 0x247   : > { %s2488_s21 = smov %s1991_s24  ;;  %17 = sbr.rel (!%p15_p3) target bundleno = 3 (0x3), region = 75 }
 0x24e   :  { %1443 = vsyncpa [#allocation3], 1 }
 0x24f   :  { %1445 = vsyncpa [#allocation3 + $0x1], 1 }

</bundles_post_ra>
